<compile_context>
chip_gen: v7x
topology: tpu7x:2x2x1
jax: 0.10.0
libtpu: 0.0.40
codegen_flags: <defaults>
</compile_context>

<pallas_src>
import jax
import jax.numpy as jnp
from jax.experimental import pallas as pl
from jax.experimental.pallas import tpu as pltpu


def _round_up(a, m):
    return ((a + m - 1) // m) * m


# ----------------------------------------------------------------------------
# Pallas kernel: one (batch b, MG-tile m, pixel-tile p) grid step.
# ----------------------------------------------------------------------------
def _group_conv_pallas(xf, w_kk, bias_col, *, K, Wp, tp, n_p, tmg, out_dtype):
    """xf:       [B, Cin, (n_p+1)*tp]  bf16  (flattened, zero-padded x_pad)
       w_kk:     [K*K, MG_pad, Cin]    bf16  (tap-major continuous kernel)
       bias_col: [MG_pad, 1]           f32
       returns   [B, MG_pad, n_p*tp]   out_dtype, columns q = ho*Wp + wo."""
    B, Cin, _ = xf.shape
    KK, mg_pad, _ = w_kk.shape
    n_mg = mg_pad // tmg

    def kernel(xa_ref, xb_ref, w_ref, bias_ref, out_ref):
        # xa/xb: (1, Cin, tp) bf16 — current pixel tile + next tile (halo).
        # w:     (KK, tmg, Cin) bf16   bias: (tmg, 1) f32   out: (1, tmg, tp).
        xcat = jnp.concatenate([xa_ref[0], xb_ref[0]], axis=-1)     # (Cin, 2*tp)
        acc = jnp.zeros((tmg, tp), jnp.float32)
        for ky in range(K):                       # K^2 static taps, unrolled
            for kx in range(K):
                d = ky * Wp + kx                  # static lane shift
                xs = xcat[:, d:d + tp]            # (Cin, tp) shifted view
                acc = acc + jnp.dot(w_ref[ky * K + kx], xs,
                                    preferred_element_type=jnp.float32)
        # lane-broadcast bias column on the VPU, lane-dense store
        out_ref[0] = (acc + bias_ref[...]).astype(out_ref.dtype)

    return pl.pallas_call(
        kernel,
        out_shape=jax.ShapeDtypeStruct((B, mg_pad, n_p * tp), out_dtype),
        grid_spec=pltpu.PrefetchScalarGridSpec(
            num_scalar_prefetch=0,
            grid=(B, n_mg, n_p),
            in_specs=[
                # current pixel tile of the flattened input
                pl.BlockSpec((1, Cin, tp), lambda b, m, p: (b, 0, p)),
                # next pixel tile (halo for the K^2 static lane shifts)
                pl.BlockSpec((1, Cin, tp), lambda b, m, p: (b, 0, p + 1)),
                # weights: constant over (b, p) -> only re-fetched per MG tile
                pl.BlockSpec((KK, tmg, Cin), lambda b, m, p: (0, m, 0)),
                # bias column (tmg, 1): tiny, replaces the old (MG, TP) stream
                pl.BlockSpec((tmg, 1), lambda b, m, p: (m, 0)),
            ],
            out_specs=pl.BlockSpec((1, tmg, tp), lambda b, m, p: (b, m, p)),
        ),
        compiler_params=pltpu.CompilerParams(
            # no reduction grid axis -> all parallel (usable by v7x megacore)
            dimension_semantics=("parallel", "parallel", "parallel"),
            # safe on v7x (64 MiB physical) as well as v5e/v6e
            vmem_limit_bytes=32 * 1024 * 1024),
    )(xf, xf, w_kk, bias_col)


# ----------------------------------------------------------------------------
# Tiling heuristics
# ----------------------------------------------------------------------------
def _pick_pixel_tile(P, d_max, max_tp=1024):
    """Lane-dense pixel tile: multiple of 128, >= halo (d_max+1), <= max_tp
    when possible.  Returns (tp, n_p)."""
    tp = min(max_tp, _round_up(max(P, 1), 128))
    tp = max(tp, _round_up(d_max + 1, 128))       # halo must fit in one tile
    n_p = -(-P // tp)
    return tp, n_p


def _pick_mg_tile(MG, cap=256):
    """Tile Cout*G into sublane-aligned chunks so W / out tiles stay bounded
    and megacore gets an extra parallel axis."""
    if MG <= cap:
        mg_pad = _round_up(MG, 8)
        return mg_pad, mg_pad
    return _round_up(MG, cap), cap


# ----------------------------------------------------------------------------
# Continuous-kernel generation (SIREN-like MLP sampled on rotated kernel grids)
# ----------------------------------------------------------------------------
def _make_group_kernels(key, in_channels, out_channels, num_group_elem,
                        kernel_size, sampling_method="discretise", hidden=32):
    """Returns [G, Cout, Cin, K, K] continuous-kernel samples."""
    K = kernel_size
    lin = jnp.linspace(-1.0, 1.0, K) if K > 1 else jnp.zeros((1,))
    yy, xx = jnp.meshgrid(lin, lin, indexing="ij")
    coords = jnp.stack([xx, yy], axis=-1).reshape(K * K, 2)

    if sampling_method == "discretise":
        angles = 2.0 * jnp.pi * jnp.arange(num_group_elem) / num_group_elem
    else:  # 'uniform'
        angles = jax.random.uniform(jax.random.fold_in(key, 17),
                                    (num_group_elem,), maxval=2.0 * jnp.pi)
    c, s = jnp.cos(angles), jnp.sin(angles)
    rot = jnp.stack([jnp.stack([c, -s], -1), jnp.stack([s, c], -1)], -2)
    rcoords = jnp.einsum("gij,pj->gpi", rot, coords)               # (G, K*K, 2)

    k1, k2 = jax.random.split(key, 2)
    W1 = jax.random.normal(k1, (2, hidden), jnp.float32) / jnp.sqrt(2.0)
    b1 = jnp.zeros((hidden,), jnp.float32)
    W2 = jax.random.normal(k2, (hidden, in_channels * out_channels),
                           jnp.float32) / jnp.sqrt(float(hidden))

    h = jnp.sin(rcoords @ W1 + b1)                                 # (G,K*K,hid)
    kern = h @ W2                                                  # (G,K*K,Cin*Cout)
    kern = kern.reshape(num_group_elem, K, K, in_channels, out_channels)
    kern = jnp.transpose(kern, (0, 4, 3, 1, 2))                    # (G,Cout,Cin,K,K)
    return kern.astype(jnp.float32)


# ----------------------------------------------------------------------------
# Module wrapper
# ----------------------------------------------------------------------------
class ContinuousKernelGroupConv:
    """JAX/Pallas port of ck_g_cnn.nn.conv.ck_g_conv.ContinuousKernelGroupConv
    (lifting group convolution forward)."""

    def __init__(self, in_channels, out_channels, group, num_group_elem,
                 kernel_size, sampling_method, padding, stride, bias=False,
                 key=jax.random.PRNGKey(0), out_dtype=jnp.float32):
        self.in_channels = in_channels
        self.out_channels = out_channels
        self.group = group                      # group name (e.g. "SO2") – glue only
        self.num_group_elem = num_group_elem
        self.sampling_method = sampling_method
        self.kernel_size = kernel_size
        self.stride = stride
        self.out_dtype = out_dtype              # bf16 here halves HBM writeback
        if padding:
            self.padding = (kernel_size // 2, kernel_size // 2)
        else:
            self.padding = 0
        # bias (torch.zeros(out_channels)) — not trainable, zeros
        self.bias = jnp.zeros((out_channels,), jnp.float32) if bias else None
        # deterministic continuous kernel weights  [G, Cout, Cin, K, K]
        self.kernels = _make_group_kernels(key, in_channels, out_channels,
                                           num_group_elem, kernel_size,
                                           sampling_method)

    def __call__(self, x):
        """x: [B, Cin, H, W] (NCHW)  ->  [B, Cout, G, Ho, Wo]."""
        B, Cin, H, W = x.shape
        K, G, Cout, s = (self.kernel_size, self.num_group_elem,
                         self.out_channels, self.stride)
        if self.padding == 0:
            pw = ph = 0
        else:
            pw, ph = self.padding
        x_pad = jnp.pad(x, ((0, 0), (0, 0), (ph, ph), (pw, pw)))
        Hp, Wp = H + 2 * ph, W + 2 * pw
        Ho = (Hp - K) // s + 1
        Wo = (Wp - K) // s + 1
        Ho1, Wo1 = Hp - K + 1, Wp - K + 1        # stride-1 (full) output extent
        P = Ho1 * Wp                             # computed columns q = ho*Wp+wo
        MG = Cout * G
        KK = K * K
        d_max = (K - 1) * Wp + (K - 1)           # largest static lane shift

        tp, n_p = _pick_pixel_tile(P, d_max)
        mg_pad, tmg = _pick_mg_tile(MG)

        # flatten spatially; halo needs one extra pixel tile of zero padding
        xf = x_pad.astype(jnp.bfloat16).reshape(B, Cin, Hp * Wp)
        xlen = (n_p + 1) * tp
        xf = jnp.pad(xf, ((0, 0), (0, 0), (0, xlen - Hp * Wp)))

        # weights, tap-major: (K*K, MG, Cin), rows ordered (cout, g) so the
        # kernel output reshapes directly to [B, Cout, G, Ho, Wo]
        w = jnp.transpose(self.kernels, (1, 0, 2, 3, 4)).reshape(MG, Cin, K, K)
        w_kk = jnp.transpose(w, (2, 3, 0, 1)).reshape(KK, MG, Cin)
        if mg_pad != MG:
            w_kk = jnp.pad(w_kk, ((0, 0), (0, mg_pad - MG), (0, 0)))
        w_kk = w_kk.astype(jnp.bfloat16)

        bias = (self.bias if self.bias is not None
                else jnp.zeros((Cout,), jnp.float32))
        bias_col = jnp.repeat(bias, G)                               # (MG,)
        if mg_pad != MG:
            bias_col = jnp.pad(bias_col, (0, mg_pad - MG))
        bias_col = bias_col.reshape(mg_pad, 1).astype(jnp.float32)

        out = _group_conv_pallas(xf, w_kk, bias_col, K=K, Wp=Wp, tp=tp,
                                 n_p=n_p, tmg=tmg, out_dtype=self.out_dtype)

        # strip MG/pixel padding, un-stride the column layout, subsample
        y = out[:, :MG, :P].reshape(B, MG, Ho1, Wp)[:, :, :, :Wo1]
        if s > 1:
            # TODO(synk): dedicated strided path (avoids s^2 overcompute)
            y = y[:, :, ::s, ::s]
        y = y[:, :, :Ho, :Wo].reshape(B, Cout, G, Ho, Wo)
        return y


# ----------------------------------------------------------------------------
# Pure-JAX reference (same math — bf16-quantised operands, f32 accumulate).
# ----------------------------------------------------------------------------
def _reference(module, x):
    B, Cin, H, W = x.shape
    K, G, Cout, s = (module.kernel_size, module.num_group_elem,
                     module.out_channels, module.stride)
    ph = pw = 0 if module.padding == 0 else module.padding[0]
    x_pad = jnp.pad(x, ((0, 0), (0, 0), (ph, ph), (pw, pw)))
    x_q = x_pad.astype(jnp.bfloat16).astype(jnp.float32)
    w = jnp.transpose(module.kernels, (1, 0, 2, 3, 4)).reshape(Cout * G, Cin, K, K)
    w_q = w.astype(jnp.bfloat16).astype(jnp.float32)
    y = jax.lax.conv_general_dilated(
        x_q, w_q, window_strides=(s, s), padding="VALID",
        dimension_numbers=("NCHW", "OIHW", "NCHW"),
        precision=jax.lax.Precision.HIGHEST)                        # (B,MG,Ho,Wo)
    bias = module.bias if module.bias is not None else jnp.zeros((Cout,))
    y = y + jnp.repeat(bias, G)[None, :, None, None]
    Ho = (H + 2 * ph - K) // s + 1
    Wo = (W + 2 * pw - K) // s + 1
    return y.reshape(B, Cout, G, Ho, Wo)


if __name__ == "__main__":
    key = jax.random.PRNGKey(0)
    B, Cin, H, W = 2, 4, 16, 16
    Cout, G, K = 8, 4, 3

    module = ContinuousKernelGroupConv(
        in_channels=Cin, out_channels=Cout, group="SO2", num_group_elem=G,
        kernel_size=K, sampling_method="discretise", padding=True, stride=1,
        bias=True, key=key)

    x = jax.random.normal(jax.random.fold_in(key, 1), (B, Cin, H, W),
                          jnp.float32)

    out = jax.block_until_ready(module(x))
    assert out.shape == (B, Cout, G, H, W), out.shape

    ref = jax.block_until_ready(_reference(module, x))
    # both paths use identically bf16-quantised operands + f32 accumulation;
    # only accumulation order (per-tap MXU dots vs XLA conv) differs
    assert bool(jnp.allclose(out.astype(jnp.float32), ref,
                             rtol=2e-2, atol=2e-2)), "mismatch vs reference"

    print("KERNEL_OK")
</pallas_src>

<mosaic_0001>
module attributes {stable_mosaic.version = 11 : i64} {
  func.func @kernel(%arg0: i32, %arg1: i32, %arg2: i32, %arg3: memref<1x4x384xbf16, #tpu.memory_space<vmem>>, %arg4: memref<1x4x384xbf16, #tpu.memory_space<vmem>>, %arg5: memref<9x32x4xbf16, #tpu.memory_space<vmem>>, %arg6: memref<32x1xf32, #tpu.memory_space<vmem>>, %arg7: memref<1x32x384xf32, #tpu.memory_space<vmem>>) attributes {dimension_semantics = [#tpu.dimension_semantics<parallel>, #tpu.dimension_semantics<parallel>, #tpu.dimension_semantics<parallel>], iteration_bounds = array<i64: 2, 1, 1>, scalar_prefetch = 0 : i64, scratch_operands = 0 : i64, tpu.core_type = #tpu.core_type<tc>, window_params = [{transform_indices = @transform_0, window_bounds = array<i64: 1, 4, 384>}, {transform_indices = @transform_1, window_bounds = array<i64: 1, 4, 384>}, {transform_indices = @transform_2, window_bounds = array<i64: 9, 32, 4>}, {transform_indices = @transform_3, window_bounds = array<i64: 32, 1>}, {transform_indices = @transform_4, window_bounds = array<i64: 1, 32, 384>}]} {
    %c0 = arith.constant 0 : index
    %c0_0 = arith.constant 0 : index
    %c0_1 = arith.constant 0 : index
    %0 = vector.load %arg3[%c0, %c0_0, %c0_1] : memref<1x4x384xbf16, #tpu.memory_space<vmem>>, vector<1x4x384xbf16>
    %1 = vector.shape_cast %0 : vector<1x4x384xbf16> to vector<4x384xbf16>
    %c0_2 = arith.constant 0 : index
    %c0_3 = arith.constant 0 : index
    %c0_4 = arith.constant 0 : index
    %2 = vector.load %arg4[%c0_2, %c0_3, %c0_4] : memref<1x4x384xbf16, #tpu.memory_space<vmem>>, vector<1x4x384xbf16>
    %3 = vector.shape_cast %2 : vector<1x4x384xbf16> to vector<4x384xbf16>
    %4 = tpu.concatenate %1, %3 in 1 : vector<4x384xbf16>, vector<4x384xbf16> -> vector<4x768xbf16>
    %cst = arith.constant 0.000000e+00 : f32
    %5 = vector.broadcast %cst : f32 to vector<32x384xf32>
    %6 = vector.extract_strided_slice %4 {offsets = [0, 0], sizes = [4, 384], strides = [1, 1]} : vector<4x768xbf16> to vector<4x384xbf16>
    %c0_5 = arith.constant 0 : index
    %c0_6 = arith.constant 0 : index
    %c0_7 = arith.constant 0 : index
    %7 = vector.load %arg5[%c0_5, %c0_6, %c0_7] : memref<9x32x4xbf16, #tpu.memory_space<vmem>>, vector<1x32x4xbf16>
    %8 = vector.shape_cast %7 : vector<1x32x4xbf16> to vector<32x4xbf16>
    %cst_8 = arith.constant dense<0.000000e+00> : vector<32x384xf32>
    %9 = tpu.matmul %8, %6, %cst_8 {dimension_numbers = #tpu.dot_dimension_numbers<[1], [0], [0], [1], [0, 0, 1, 1], [], []>} : vector<32x4xbf16>, vector<4x384xbf16>, vector<32x384xf32> -> vector<32x384xf32>
    %10 = arith.addf %5, %9 : vector<32x384xf32>
    %11 = vector.extract_strided_slice %4 {offsets = [0, 1], sizes = [4, 384], strides = [1, 1]} : vector<4x768xbf16> to vector<4x384xbf16>
    %c1 = arith.constant 1 : index
    %c0_9 = arith.constant 0 : index
    %c0_10 = arith.constant 0 : index
    %12 = vector.load %arg5[%c1, %c0_9, %c0_10] : memref<9x32x4xbf16, #tpu.memory_space<vmem>>, vector<1x32x4xbf16>
    %13 = vector.shape_cast %12 : vector<1x32x4xbf16> to vector<32x4xbf16>
    %cst_11 = arith.constant dense<0.000000e+00> : vector<32x384xf32>
    %14 = tpu.matmul %13, %11, %cst_11 {dimension_numbers = #tpu.dot_dimension_numbers<[1], [0], [0], [1], [0, 0, 1, 1], [], []>} : vector<32x4xbf16>, vector<4x384xbf16>, vector<32x384xf32> -> vector<32x384xf32>
    %15 = arith.addf %10, %14 : vector<32x384xf32>
    %16 = vector.extract_strided_slice %4 {offsets = [0, 2], sizes = [4, 384], strides = [1, 1]} : vector<4x768xbf16> to vector<4x384xbf16>
    %c2 = arith.constant 2 : index
    %c0_12 = arith.constant 0 : index
    %c0_13 = arith.constant 0 : index
    %17 = vector.load %arg5[%c2, %c0_12, %c0_13] : memref<9x32x4xbf16, #tpu.memory_space<vmem>>, vector<1x32x4xbf16>
    %18 = vector.shape_cast %17 : vector<1x32x4xbf16> to vector<32x4xbf16>
    %cst_14 = arith.constant dense<0.000000e+00> : vector<32x384xf32>
    %19 = tpu.matmul %18, %16, %cst_14 {dimension_numbers = #tpu.dot_dimension_numbers<[1], [0], [0], [1], [0, 0, 1, 1], [], []>} : vector<32x4xbf16>, vector<4x384xbf16>, vector<32x384xf32> -> vector<32x384xf32>
    %20 = arith.addf %15, %19 : vector<32x384xf32>
    %21 = vector.extract_strided_slice %4 {offsets = [0, 18], sizes = [4, 384], strides = [1, 1]} : vector<4x768xbf16> to vector<4x384xbf16>
    %c3 = arith.constant 3 : index
    %c0_15 = arith.constant 0 : index
    %c0_16 = arith.constant 0 : index
    %22 = vector.load %arg5[%c3, %c0_15, %c0_16] : memref<9x32x4xbf16, #tpu.memory_space<vmem>>, vector<1x32x4xbf16>
    %23 = vector.shape_cast %22 : vector<1x32x4xbf16> to vector<32x4xbf16>
    %cst_17 = arith.constant dense<0.000000e+00> : vector<32x384xf32>
    %24 = tpu.matmul %23, %21, %cst_17 {dimension_numbers = #tpu.dot_dimension_numbers<[1], [0], [0], [1], [0, 0, 1, 1], [], []>} : vector<32x4xbf16>, vector<4x384xbf16>, vector<32x384xf32> -> vector<32x384xf32>
    %25 = arith.addf %20, %24 : vector<32x384xf32>
    %26 = vector.extract_strided_slice %4 {offsets = [0, 19], sizes = [4, 384], strides = [1, 1]} : vector<4x768xbf16> to vector<4x384xbf16>
    %c4 = arith.constant 4 : index
    %c0_18 = arith.constant 0 : index
    %c0_19 = arith.constant 0 : index
    %27 = vector.load %arg5[%c4, %c0_18, %c0_19] : memref<9x32x4xbf16, #tpu.memory_space<vmem>>, vector<1x32x4xbf16>
    %28 = vector.shape_cast %27 : vector<1x32x4xbf16> to vector<32x4xbf16>
    %cst_20 = arith.constant dense<0.000000e+00> : vector<32x384xf32>
    %29 = tpu.matmul %28, %26, %cst_20 {dimension_numbers = #tpu.dot_dimension_numbers<[1], [0], [0], [1], [0, 0, 1, 1], [], []>} : vector<32x4xbf16>, vector<4x384xbf16>, vector<32x384xf32> -> vector<32x384xf32>
    %30 = arith.addf %25, %29 : vector<32x384xf32>
    %31 = vector.extract_strided_slice %4 {offsets = [0, 20], sizes = [4, 384], strides = [1, 1]} : vector<4x768xbf16> to vector<4x384xbf16>
    %c5 = arith.constant 5 : index
    %c0_21 = arith.constant 0 : index
    %c0_22 = arith.constant 0 : index
    %32 = vector.load %arg5[%c5, %c0_21, %c0_22] : memref<9x32x4xbf16, #tpu.memory_space<vmem>>, vector<1x32x4xbf16>
    %33 = vector.shape_cast %32 : vector<1x32x4xbf16> to vector<32x4xbf16>
    %cst_23 = arith.constant dense<0.000000e+00> : vector<32x384xf32>
    %34 = tpu.matmul %33, %31, %cst_23 {dimension_numbers = #tpu.dot_dimension_numbers<[1], [0], [0], [1], [0, 0, 1, 1], [], []>} : vector<32x4xbf16>, vector<4x384xbf16>, vector<32x384xf32> -> vector<32x384xf32>
    %35 = arith.addf %30, %34 : vector<32x384xf32>
    %36 = vector.extract_strided_slice %4 {offsets = [0, 36], sizes = [4, 384], strides = [1, 1]} : vector<4x768xbf16> to vector<4x384xbf16>
    %c6 = arith.constant 6 : index
    %c0_24 = arith.constant 0 : index
    %c0_25 = arith.constant 0 : index
    %37 = vector.load %arg5[%c6, %c0_24, %c0_25] : memref<9x32x4xbf16, #tpu.memory_space<vmem>>, vector<1x32x4xbf16>
    %38 = vector.shape_cast %37 : vector<1x32x4xbf16> to vector<32x4xbf16>
    %cst_26 = arith.constant dense<0.000000e+00> : vector<32x384xf32>
    %39 = tpu.matmul %38, %36, %cst_26 {dimension_numbers = #tpu.dot_dimension_numbers<[1], [0], [0], [1], [0, 0, 1, 1], [], []>} : vector<32x4xbf16>, vector<4x384xbf16>, vector<32x384xf32> -> vector<32x384xf32>
    %40 = arith.addf %35, %39 : vector<32x384xf32>
    %41 = vector.extract_strided_slice %4 {offsets = [0, 37], sizes = [4, 384], strides = [1, 1]} : vector<4x768xbf16> to vector<4x384xbf16>
    %c7 = arith.constant 7 : index
    %c0_27 = arith.constant 0 : index
    %c0_28 = arith.constant 0 : index
    %42 = vector.load %arg5[%c7, %c0_27, %c0_28] : memref<9x32x4xbf16, #tpu.memory_space<vmem>>, vector<1x32x4xbf16>
    %43 = vector.shape_cast %42 : vector<1x32x4xbf16> to vector<32x4xbf16>
    %cst_29 = arith.constant dense<0.000000e+00> : vector<32x384xf32>
    %44 = tpu.matmul %43, %41, %cst_29 {dimension_numbers = #tpu.dot_dimension_numbers<[1], [0], [0], [1], [0, 0, 1, 1], [], []>} : vector<32x4xbf16>, vector<4x384xbf16>, vector<32x384xf32> -> vector<32x384xf32>
    %45 = arith.addf %40, %44 : vector<32x384xf32>
    %46 = vector.extract_strided_slice %4 {offsets = [0, 38], sizes = [4, 384], strides = [1, 1]} : vector<4x768xbf16> to vector<4x384xbf16>
    %c8 = arith.constant 8 : index
    %c0_30 = arith.constant 0 : index
    %c0_31 = arith.constant 0 : index
    %47 = vector.load %arg5[%c8, %c0_30, %c0_31] : memref<9x32x4xbf16, #tpu.memory_space<vmem>>, vector<1x32x4xbf16>
    %48 = vector.shape_cast %47 : vector<1x32x4xbf16> to vector<32x4xbf16>
    %cst_32 = arith.constant dense<0.000000e+00> : vector<32x384xf32>
    %49 = tpu.matmul %48, %46, %cst_32 {dimension_numbers = #tpu.dot_dimension_numbers<[1], [0], [0], [1], [0, 0, 1, 1], [], []>} : vector<32x4xbf16>, vector<4x384xbf16>, vector<32x384xf32> -> vector<32x384xf32>
    %50 = arith.addf %45, %49 : vector<32x384xf32>
    %c0_33 = arith.constant 0 : index
    %c0_34 = arith.constant 0 : index
    %51 = vector.load %arg6[%c0_33, %c0_34] : memref<32x1xf32, #tpu.memory_space<vmem>>, vector<32x1xf32>
    %52 = vector.broadcast %51 : vector<32x1xf32> to vector<32x384xf32>
    %53 = arith.addf %50, %52 : vector<32x384xf32>
    %c0_35 = arith.constant 0 : index
    %c0_36 = arith.constant 0 : index
    %c0_37 = arith.constant 0 : index
    %54 = vector.load %arg7[%c0_35, %c0_36, %c0_37] : memref<1x32x384xf32, #tpu.memory_space<vmem>>, vector<1x32x384xf32>
    %55 = vector.shape_cast %54 : vector<1x32x384xf32> to vector<32x384xf32>
    %56 = vector.shape_cast %53 : vector<32x384xf32> to vector<1x32x384xf32>
    tpu.vector_store %arg7[%c0_35, %c0_36, %c0_37], %56 {strides = array<i32>} : memref<1x32x384xf32, #tpu.memory_space<vmem>>, vector<1x32x384xf32>,
    return
  }
  func.func @transform_0(%arg0: i32, %arg1: i32, %arg2: i32) -> (i32, i32, i32) {
    %c0_i32 = arith.constant 0 : i32
    %c0_i32_0 = arith.constant 0 : i32
    return %arg0, %c0_i32, %arg2 : i32, i32, i32
  }
  func.func @transform_1(%arg0: i32, %arg1: i32, %arg2: i32) -> (i32, i32, i32) {
    %c1_i32 = arith.constant 1 : i32
    %0 = arith.addi %arg2, %c1_i32 : i32
    %c0_i32 = arith.constant 0 : i32
    %c0_i32_0 = arith.constant 0 : i32
    return %arg0, %c0_i32, %0 : i32, i32, i32
  }
  func.func @transform_2(%arg0: i32, %arg1: i32, %arg2: i32) -> (i32, i32, i32) {
    %c0_i32 = arith.constant 0 : i32
    %c0_i32_0 = arith.constant 0 : i32
    %c0_i32_1 = arith.constant 0 : i32
    return %c0_i32, %arg1, %c0_i32_0 : i32, i32, i32
  }
  func.func @transform_3(%arg0: i32, %arg1: i32, %arg2: i32) -> (i32, i32) {
    %c0_i32 = arith.constant 0 : i32
    %c0_i32_0 = arith.constant 0 : i32
    return %arg1, %c0_i32 : i32, i32
  }
  func.func @transform_4(%arg0: i32, %arg1: i32, %arg2: i32) -> (i32, i32, i32) {
    %c0_i32 = arith.constant 0 : i32
    return %arg0, %arg1, %arg2 : i32, i32, i32
  }
}

</mosaic_0001>

<bundles_post_ra>
// kernel: tpu_custom_call.1
= control target key start
LH: loop header
LB: loop body
LE: loop exit
PB: predicated region body
PF: predicated region fallthrough
CT: control target
= control target key end

     0   :  { %9 = vsyncpa [#allocation3], 0  ;;  %s2795_s0 = inlined_call_operand.vmem [shape: bf16[2,4,768], index: 0, kind: input, shape index: {}]   ;;  %s2796_s1 = inlined_call_operand.vmem [shape: bf16[2,4,768], index: 1, kind: input, shape index: {}]   ;;  %s2797_s2 = inlined_call_operand.vmem [shape: bf16[9,32,4], index: 2, kind: input, shape index: {}]   ;;  %s2798_s3 = inlined_call_operand.vmem [shape: f32[32,1], index: 3, kind: input, shape index: {}]   ;;  %s2799_s4 = inlined_call_operand.hbm [shape: f32[2,32,384], index: 4, kind: output, shape index: {}]  }
   0x1   :  { %11 = vsyncpa [#allocation3 + $0x1], 0  ;;  %s2427_s15 = smov 0   ;;  %s2429_s16 = smov 0  }
   0x2   :  { %s2431_s17 = smov 0   ;;  %s2433_s18 = smov 0  }
   0x3   :  { %s2435_s19 = smov 0   ;;  %s2437_s20 = smov 0  }
   0x4 LB: > { %s1920_s21 = sadd.s32 4294967295, %s2387_s20   ;;  %s1921_s22 = sadd.s32 4294967294, %s2387_s20   ;;  %s2387_s20 = sphi %s2437_s20, %s17_s20   ;;  %s2383_s19 = sphi %s2435_s19, %s2806_s19   ;;  %s2379_s18 = sphi %s2433_s18, %s2805_s18   ;;  %s2375_s17 = sphi %s2431_s17, %s2804_s17   ;;  %s2371_s16 = sphi %s2429_s16, %s2803_s16   ;;  %s2367_s15 = sphi %s2427_s15, %s2802_s15  }
   0x5   : > { %s36_s23 = sadd.s32 1, %s2383_s19  ;;  %s157_s24 = sadd.s32 1, %s2375_s17 }
   0x6   : > { %p38_p0 = scmp.ge.s32.totalorder %s36_s23, 2  ;;  %p167_p1 = scmp.ne.s32.totalorder %s2375_s17, %s2371_s16 }
   0x7   : > { %p168_p2 = scmp.eq.s32.totalorder %s1920_s21, 1  ;;  %p173_p3 = scmp.ne.s32.totalorder %s2371_s16, %s2367_s15 }
   0x8   : > { %s2808_s23 = smov (%p38_p0, %s36_s23), 0  ;;  %p174_p5 = scmp.eq.s32.totalorder %s1921_s22, 1 }
   0x9   : > { %p2467_p4 = por %p168_p2, %p167_p1  ;;  %s150_s26 = ssub.s32 %s2383_s19, %s2808_s23 }
   0xa   : > { %p1926_p6 = scmp.ge.s32.totalorder %s2387_s20, 1  ;;  %p155_p7 = scmp.eq.s32.totalorder %s150_s26, 0 }
   0xb   : > { %p2474_p8 = por %p174_p5, %p173_p3  ;;  %p238_p9 = scmp.lt.s32.totalorder %s2387_s20, 3 }
   0xc   : > { %s2480_s28 = scalar_select %p155_p7, %s2375_s17, %s157_s24  }
   0xd   : > { %p239_p10 = pnand %p1926_p6, %p238_p9 }
   0xe   : > { %p289_p11 = scmp.lt.s32.totalorder (!%p239_p10), %s2379_s18, 1  ;;  %v332_v0 = vlaneseq (!%p239_p10)  ;;  %v2389_v1 = vmov (!%p239_p10), 1983009808   ;;  %v2390_v6 = vmov (!%p239_p10), 0   ;;  %s2391_s12 = smov (!%p239_p10), 127   ;;  %vm379_vm0 = vcmask (!%p239_p10), 1039360  }
   0xf   : > { %242 = sbr.rel (%p239_p10) target bundleno = 510 (0x1fe), region = 36  ;;  %v330_v2 = vunpack.c.l.s4 (!%p239_p10), %v2389_v1  ;;  %432 = vmatprep.mubr.bf16.mxu1 (!%p239_p10), %v2390_v6  ;;  %703 = vmatprep.mubr.bf16.mxu0 (!%p239_p10), %v2390_v6  ;;  %s2392_s13 = smov (!%p239_p10), 126   ;;  %vm390_vm1 = vcmask (!%p239_p10), 1041408   ;;  %v2291_v20 = vld [vmem:[%s2797_s2 + $0x10] sm:$0xff] (!%p239_p10)   ;;  %v1721_v21 = vld [vmem:[%s2798_s3] sm:$0xff] (!%p239_p10)  ;;  %v1722_v22 = vld [vmem:[%s2798_s3 + $0x8] sm:$0xff] (!%p239_p10) }
  0x10   : > { %v333_v3 = vshrl.u32 (!%p239_p10), %v332_v0, 7  ;;  %2288 = vset.pattern.permute.xlu0 (!%p239_p10), %v2390_v6  ;;  %2289 = vset.pattern.permute.xlu1 (!%p239_p10), %v2390_v6  ;;  %s2393_s14 = smov (!%p239_p10), 110   ;;  %s2394_s21 = smov (!%p239_p10), 109   ;;  %vm383_vm2 = vcmask (!%p239_p10), 31744   ;;  %vm652_vm3 = vcmask (!%p239_p10), 1031168   ;;  %v1723_v25 = vld [vmem:[%s2798_s3 + $0x10] sm:$0xff] (!%p239_p10) }
  0x11   : > { %v331_v4 = vunpack.c.0.s8 (!%p239_p10), %v330_v2  ;;  %s2395_s22 = smov (!%p239_p10), 108   ;;  %s2396_s24 = smov (!%p239_p10), 92   ;;  %v1724_v28 = vld [vmem:[%s2798_s3 + $0x18] sm:$0xff] (!%p239_p10)  ;;  %vm808_vm4 = vcmask (!%p239_p10), 900096   ;;  %v2559_v35 = vld [vmem:[%s2797_s2 + $0x20] sm:$0xff] (!%p239_p10)   ;;  %v2573_v43 = vld [vmem:[%s2797_s2 + $0x28] sm:$0xff] (!%p239_p10)  }
  0x12   : > { %s2397_s26 = smov (!%p239_p10), 91   ;;  %v2292_v34 = vld [vmem:[%s2797_s2 + $0x18] sm:$0xff] (!%p239_p10)   ;;  %vm964_vm5 = vcmask (!%p239_p10), 891904   ;;  %v2295_v49 = vld [vmem:[%s2797_s2] sm:$0xff] (!%p239_p10)   ;;  %v2296_v50 = vld [vmem:[%s2797_s2 + $0x30] sm:$0xff] (!%p239_p10)   ;;  %vm1120_vm6 = vcmask (!%p239_p10), 883712  }
  0x13   : > { %v334_v5 = vsub.s32 (!%p239_p10), %v331_v4, %v333_v3  ;;  %v2297_v59 = vld [vmem:[%s2797_s2 + $0x8] sm:$0xff] (!%p239_p10)   ;;  %v2298_v60 = vld [vmem:[%s2797_s2 + $0x38] sm:$0xff] (!%p239_p10)   ;;  %v2299_v63 = vld [vmem:[%s2797_s2 + $0x40] sm:$0xff] (!%p239_p10)   ;;  %vm1276_vm7 = vcmask (!%p239_p10), 752640   ;;  %vm1432_vm8 = vcmask (!%p239_p10), 744448   ;;  %vm1588_vm9 = vcmask (!%p239_p10), 736256  }
  0x14   : > { %s2399_s9 = smov (!%p239_p10), [#allocation2]  }
  0x15   : > { %s2313_s10 = sshll.u32 (!%p239_p10), %s2399_s9, 4  ;;  %s2314_s10 = int_to_ptr.vmem [resolvable:$false] %s2313_s10 }
  0x16   : > { %s290_s29 = scalar_select %p289_p11, %s2379_s18, 1 }
  0x18   : > { %s2217_s30 = smul.u32 12, %s290_s29  ;;  %s2398_s29 = smov 90  }
  0x1a   : > { %s296_s7 = scalar_lea.vmem %s2795_s0, %s2217_s30  ;;  %s2029_s8 = sadd.s32 6, %s2217_s30 }
  0x1b   : > { %v325_v7 = vld [vmem:[%s296_s7] sm:$0x3f]  ;;  %s307_s11 = scalar_lea.vmem %s2796_s1, %s2029_s8 }
  0x1c   : > { %v2491_v8 = vrot.slane %v325_v7, %v334_v5  ;;  %v328_v9 = vcombine.high %v325_v7, %v325_v7  ;;  %v1929_v12 = vld.sshfl [vmem:[%s307_s11] sm:$0x3f pattern:$0x76325410]  ;;  %s2315_s11 = scalar_lea.vmem %s2314_s10, 3072 }
  0x1e   : > { %371 = vrot.lane.b32.xlu0 %v2491_v8, %s2391_s12  ;;  %v2497_v10 = vrot.slane %v328_v9, %v334_v5  ;;  %v2501_v11 = vcombine.high %v2491_v8, %v2491_v8  ;;  %v519_v45 = vsel %vm390_vm1, %v2491_v8, 0 }
  0x20   : > { %375 = vrot.lane.b32.xlu1 %v2497_v10, %s2391_s12  ;;  %v525_v53 = vsel %vm390_vm1, %v2497_v10, 0 }
  0x22   : > { %373 = vrot.lane.b32.xlu0 %v2501_v11, %s2391_s12 }
  0x24   : > { %377 = vrot.lane.b32.xlu1 %v1929_v12, %s2391_s12 }
  0x26   : > { %644 = vrot.lane.b32.xlu0 %v2491_v8, %s2392_s13 }
  0x28   : > { %646 = vrot.lane.b32.xlu1 %v2501_v11, %s2392_s13 }
  0x2a   : > { %648 = vrot.lane.b32.xlu0 %v2497_v10, %s2392_s13 }
  0x2c   : > { %800 = vrot.lane.b32.xlu1 %v2491_v8, %s2393_s14 }
  0x2e   : > { %802 = vrot.lane.b32.xlu0 %v2501_v11, %s2393_s14 }
  0x30   : > { %804 = vrot.lane.b32.xlu1 %v2497_v10, %s2393_s14 }
  0x32   : > { %956 = vrot.lane.b32.xlu0 %v2491_v8, %s2394_s21 }
  0x34   : > { %958 = vrot.lane.b32.xlu1 %v2501_v11, %s2394_s21 }
  0x36   : > { %960 = vrot.lane.b32.xlu0 %v2497_v10, %s2394_s21 }
  0x38   : > { %650 = vrot.lane.b32.xlu1 %v1929_v12, %s2392_s13 }
  0x3a   : > { %806 = vrot.lane.b32.xlu0 %v1929_v12, %s2393_s14 }
  0x3c   : > { %1112 = vrot.lane.b32.xlu1 %v2491_v8, %s2395_s22 }
  0x3e   : > { %1114 = vrot.lane.b32.xlu0 %v2501_v11, %s2395_s22 }
  0x40   : > { %1116 = vrot.lane.b32.xlu1 %v2497_v10, %s2395_s22 }
  0x42   : > { %962 = vrot.lane.b32.xlu0 %v1929_v12, %s2394_s21 }
  0x44   : > { %1268 = vrot.lane.b32.xlu1 %v2491_v8, %s2396_s24 }
  0x46   : > { %1270 = vrot.lane.b32.xlu0 %v2501_v11, %s2396_s24 }
  0x48   : > { %1272 = vrot.lane.b32.xlu1 %v2497_v10, %s2396_s24 }
  0x4a   : > { %1118 = vrot.lane.b32.xlu0 %v1929_v12, %s2395_s22  ;;  %s285_s22 = sand.u32 1, %s2371_s16  }
  0x4c   : > { %1424 = vrot.lane.b32.xlu1 %v2491_v8, %s2397_s26 }
  0x4e   : > { %1426 = vrot.lane.b32.xlu0 %v2501_v11, %s2397_s26 }
  0x50   : > { %1428 = vrot.lane.b32.xlu1 %v2497_v10, %s2397_s26 }
  0x52   : > { %1274 = vrot.lane.b32.xlu0 %v1929_v12, %s2396_s24  ;;  %s2216_s24 = smul.u32 96, %s285_s22 }
  0x54   : > { %1430 = vrot.lane.b32.xlu1 %v1929_v12, %s2397_s26  ;;  %s2724_s26 = scalar_lea.vmem [#allocation2], %s2216_s24 }
  0x55   : > { %s1788_s30 = sshll.u32 %s2724_s26, 4  ;;  %s2743_s30 = int_to_ptr.vmem [resolvable:$true] %s1788_s30 }
  0x56   : > { %1580 = vrot.lane.b32.xlu0 %v2491_v8, %s2398_s29  ;;  %v2300_v8 = vld [vmem:[%s2797_s2 + $0x48] sm:$0xff]   ;;  %s2309_s8 = scalar_lea.vmem %s2743_s30, 1536  ;;  %p2316_p1 = scmp.lt.s32.totalorder %s2743_s30, %s2314_s10 }
  0x57   : > { %p2310_p12 = scmp.ne.s32.totalorder %s2743_s30, %s2309_s8  ;;  %p2317_p2 = scmp.lt.s32.totalorder %s2315_s11, %s2309_s8 }
  0x58   : > { %1582 = vrot.lane.b32.xlu1 %v2501_v11, %s2398_s29 }
  0x59   : > { %p2311_p13 = pnand %p2310_p12, %p2467_p4  ;;  %p2318_p3 = por %p2317_p2, %p2316_p1 }
  0x5a   : > { %1584 = vrot.lane.b32.xlu0 %v2497_v10, %s2398_s29 }
  0x5b   : > { %p2312_p0 = pneg %p2311_p13 }
  0x5c   : > { %1586 = vrot.lane.b32.xlu1 %v1929_v12, %s2398_s29  ;;  %s2219_s29 = smul.u32 1536, %s2379_s18  ;;  %s2749_s18 = scalar_lea.sflag [#allocation3], %s285_s22 }
  0x5d   : > { %p2319_p5 = pnand %p2318_p3, %p2312_p0 }
  0x5e   : > { %1727 = vperm.xlu0 %2288, %v1721_v21   ;;  %s2740_s7 = scalar_lea.hbm %s2799_s4, %s2219_s29 }
  0x60   : > { %1732 = vperm.xlu1 %2289, %v1722_v22  }
  0x62   : > { %1742 = vperm.xlu0 %2288, %v1724_v28  }
  0x64   : > { %1737 = vperm.xlu1 %2289, %v1723_v25  }
  0x90   : > { %v372_v13 = vpop.permute.xlu0 %371 }
  0x92   : > { %v376_v14 = vpop.permute.xlu1 %375 }
  0x94   : > { %v374_v15 = vpop.permute.xlu0 %373 }
  0x95   : > { %v381_v16 = vsel %vm379_vm0, %v374_v15, %v376_v14  ;;  %v380_v17 = vsel %vm379_vm0, %v372_v13, %v374_v15  ;;  %v2301_v13 = vld [vmem:[%s2797_s2 + $0x50] sm:$0xff]  }
  0x96   : > { %1936 = vmatprep.subr.msk.bf16.mxu1 %vm390_vm1, %v381_v16  ;;  %v378_v18 = vpop.permute.xlu1 %377  ;;  %v392_v19 = vsel %vm390_vm1, %v380_v17, 0 }
  0x97   : > { %v382_v23 = vsel %vm379_vm0, %v376_v14, %v378_v18  ;;  %401 = vmatpush1.bf16.msra.mxu1 %v392_v19 }
  0x98   : > { %v645_v24 = vpop.permute.xlu0 %644  ;;  %2207 = vmatprep.subr.msk.bf16.mxu1 %vm390_vm1, %v382_v23  ;;  %v398_v26 = vsel %vm390_vm1, %v382_v23, 0 }
  0x9a   : > { %1937 = vmatmul.mubr.msk.bf16.vlgmr.msra.gmra.mrb[0].mxu1 %vm383_vm2, %v2291_v20  ;;  %v647_v27 = vpop.permute.xlu1 %646 }
  0x9b   : > { %2058 = vmatpush3.bf16.msra.mxu1 %v398_v26  ;;  %v653_v29 = vsel %vm652_vm3, %v645_v24, %v647_v27  ;;  %442 = vmatprep.mubr.bf16.mxu1 %v2390_v6  ;;  %v2303_v26 = vld [vmem:[%s2797_s2 + $0x60] sm:$0xff]  }
  0x9c   : > { %v649_v30 = vpop.permute.xlu0 %648  ;;  %v663_v31 = vsel %vm390_vm1, %v653_v29, 0  ;;  %1943 = vmatprep.subr.msk.bf16.mxu1 %vm390_vm1, %v2501_v11 }
  0x9d   : > { %v654_v32 = vsel %vm652_vm3, %v647_v27, %v649_v30 }
  0x9e   : > { %1954 = vmatprep.subr.msk.bf16.mxu0 %vm390_vm1, %v654_v32  ;;  %v801_v33 = vpop.permute.xlu1 %800 }
  0x9f   : > { %672 = vmatpush1.bf16.msra.mxu0 %v663_v31 }
  0xa0   : > { %v803_v36 = vpop.permute.xlu0 %802 }
  0xa1   : > { %v809_v37 = vsel %vm808_vm4, %v801_v33, %v803_v36  ;;  %v2304_v33 = vld [vmem:[%s2797_s2 + $0x68] sm:$0xff]  }
  0xa2   : > { %v819_v38 = vsel %vm390_vm1, %v809_v37, 0  ;;  %1938 = vmatmul.mubr.msk.bf16.gmra.mrb[4].mxu1 %vm383_vm2, %v2292_v34  ;;  %1955 = vmatmul.mubr.msk.bf16.vlgmr.msra.gmra.mrb[0].mxu0 %vm383_vm2, %v2559_v35  ;;  %v805_v39 = vpop.permute.xlu1 %804 }
  0xa3   : > { %v810_v40 = vsel %vm808_vm4, %v803_v36, %v805_v39  ;;  %2059 = vmatprep.mubr.msk.bf16.mxu1 %vm383_vm2, %v2291_v20  ;;  %713 = vmatprep.mubr.bf16.mxu0 %v2390_v6  ;;  %v2302_v20 = vld [vmem:[%s2797_s2 + $0x58] sm:$0xff]  }
  0xa4   : > { %v957_v41 = vpop.permute.xlu0 %956  ;;  %1965 = vmatprep.subr.msk.bf16.mxu0 %vm390_vm1, %v810_v40 }
  0xa5   : > { %828 = vmatpush1.bf16.msra.mxu0 %v819_v38 }
  0xa6   : > { %v959_v42 = vpop.permute.xlu1 %958 }
  0xa7   : > { %v965_v52 = vsel %vm964_vm5, %v957_v41, %v959_v42 }
  0xa8   : > { %v2575_v44 = vpop.permute.xlu0 %960  ;;  %v975_v54 = vsel %vm390_vm1, %v965_v52, 0 }
  0xa9   : > { %v966_v46 = vsel %vm964_vm5, %v959_v42, %v2575_v44 }
  0xaa   : > { %2060 = vmatmul.mubr.msk.bf16.vlgmr.msra.gmra.mrb[8].mxu1 %vm383_vm2, %v2292_v34  ;;  %1956 = vmatmul.mubr.msk.bf16.gmra.mrb[4].mxu0 %vm383_vm2, %v2573_v43  ;;  %v651_v47 = vpop.permute.xlu1 %650  ;;  %v2305_v34 = vld [vmem:[%s2797_s2 + $0x70] sm:$0xff]  }
  0xab   : > { %528 = vmatpush1.bf16.msra.mxu1 %v519_v45  ;;  %559 = vmatprep.mubr.bf16.mxu1 %v2390_v6  ;;  %v655_v57 = vsel %vm652_vm3, %v649_v30, %v651_v47 }
  0xac   : > { %2208 = vmatprep.subr.msk.bf16.mxu1 %vm390_vm1, %v2497_v10  ;;  %859 = vmatprep.mubr.bf16.mxu0 %v2390_v6  ;;  %v807_v48 = vpop.permute.xlu0 %806  ;;  %v669_v4 = vsel %vm390_vm1, %v655_v57, 0 }
  0xad   : > { %1976 = vmatprep.subr.msk.bf16.mxu0 %vm390_vm1, %v966_v46  ;;  %v811_v7 = vsel %vm808_vm4, %v805_v39, %v807_v48  ;;  %v2306_v39 = vld [vmem:[%s2797_s2 + $0x78] sm:$0xff]  }
  0xae   : > { %v1113_v51 = vpop.permute.xlu1 %1112  ;;  %v825_v12 = vsel %vm390_vm1, %v811_v7, 0 }
  0xb0   : > { %v1115_v55 = vpop.permute.xlu0 %1114 }
  0xb1   : > { %v1121_v0 = vsel %vm1120_vm6, %v1113_v51, %v1115_v55 }
  0xb2   : > { %1944 = vmatmul.mubr.msk.bf16.vlgmr.msra.gmra.mrb[0].mxu1 %vm383_vm2, %v2295_v49  ;;  %1966 = vmatmul.mubr.msk.bf16.vlgmr.msra.gmra.mrb[0].mxu0 %vm383_vm2, %v2296_v50  ;;  %v2601_v56 = vpop.permute.xlu1 %1116  ;;  %v1131_v2 = vsel %vm390_vm1, %v1121_v0, 0 }
  0xb3   : > { %2064 = vmatpush3.bf16.msra.mxu1 %v525_v53  ;;  %569 = vmatprep.mubr.bf16.mxu1 %v2390_v6  ;;  %v1122_v58 = vsel %vm1120_vm6, %v1115_v55, %v2601_v56 }
  0xb4   : > { %2209 = vmatprep.subr.msk.bf16.mxu1 %vm390_vm1, %v655_v57  ;;  %869 = vmatprep.mubr.bf16.mxu0 %v2390_v6  ;;  %v963_v62 = vpop.permute.xlu0 %962 }
  0xb5   : > { %984 = vmatpush1.bf16.msra.mxu0 %v975_v54  ;;  %v967_v16 = vsel %vm964_vm5, %v2575_v44, %v963_v62  ;;  %v2308_v44 = vld [vmem:[%s2797_s2 + $0x88] sm:$0xff]  }
  0xb6   : > { %1987 = vmatprep.subr.msk.bf16.mxu0 %vm390_vm1, %v1122_v58  ;;  %v1269_v61 = vpop.permute.xlu1 %1268  ;;  %v981_v22 = vsel %vm390_vm1, %v967_v16, 0 }
  0xb8   : > { %v1271_v3 = vpop.permute.xlu0 %1270 }
  0xb9   : > { %v1277_v11 = vsel %vm1276_vm7, %v1269_v61, %v1271_v3 }
  0xba   : > { %1945 = vmatmul.mubr.msk.bf16.gmra.mrb[4].mxu1 %vm383_vm2, %v2297_v59  ;;  %1967 = vmatmul.mubr.msk.bf16.gmra.mrb[4].mxu0 %vm383_vm2, %v2298_v60  ;;  %v1273_v1 = vpop.permute.xlu1 %1272  ;;  %v1287_v17 = vsel %vm390_vm1, %v1277_v11, 0 }
  0xbb   : > { %2065 = vmatprep.mubr.msk.bf16.mxu1 %vm383_vm2, %v2295_v49  ;;  %1015 = vmatprep.mubr.bf16.mxu0 %v2390_v6  ;;  %v1278_v5 = vsel %vm1276_vm7, %v1271_v3, %v1273_v1 }
  0xbc   : > { %v1119_v10 = vpop.permute.xlu0 %1118 }
  0xbd   : > { %v1123_v24 = vsel %vm1120_vm6, %v2601_v56, %v1119_v10 }
  0xbe   : > { %v1425_v9 = vpop.permute.xlu1 %1424  ;;  %v1137_v32 = vsel %vm390_vm1, %v1123_v24, 0 }
  0xc0   : > { %v1427_v14 = vpop.permute.xlu0 %1426 }
  0xc1   : > { %v1433_v25 = vsel %vm1432_vm8, %v1425_v9, %v1427_v14 }
  0xc2   : > { %1977 = vmatmul.mubr.msk.bf16.vlgmr.msra.gmra.mrb[0].mxu0 %vm383_vm2, %v2299_v63  ;;  %2066 = vmatmul.mubr.msk.bf16.vlgmr.msra.gmra.mrb[8].mxu1 %vm383_vm2, %v2297_v59  ;;  %v1429_v15 = vpop.permute.xlu1 %1428  ;;  %v1443_v29 = vsel %vm390_vm1, %v1433_v25, 0 }
  0xc3   : > { %2070 = vmatpush3.bf16.msra.mxu1 %v669_v4  ;;  %1025 = vmatprep.mubr.bf16.mxu0 %v2390_v6  ;;  %v1434_v18 = vsel %vm1432_vm8, %v1427_v14, %v1429_v15 }
  0xc4   : > { %2210 = vmatprep.subr.msk.bf16.mxu1 %vm390_vm1, %v811_v7  ;;  %1140 = vmatpush1.bf16.msra.mxu0 %v1131_v2  ;;  %v1275_v19 = vpop.permute.xlu0 %1274 }
  0xc5   : > { %2071 = vmatprep.mubr.msk.bf16.mxu1 %vm383_vm2, %v2559_v35  ;;  %1998 = vmatprep.subr.msk.bf16.mxu0 %vm390_vm1, %v1278_v5  ;;  %v1279_v31 = vsel %vm1276_vm7, %v1273_v1, %v1275_v19 }
  0xc6   : > { %v1431_v23 = vpop.permute.xlu1 %1430  ;;  %v1293_v38 = vsel %vm390_vm1, %v1279_v31, 0 }
  0xc7   : > { %v1435_v36 = vsel %vm1432_vm8, %v1429_v15, %v1431_v23 }
  0xc8   : > { %v1581_v21 = vpop.permute.xlu0 %1580  ;;  %v1449_v42 = vsel %vm390_vm1, %v1435_v36, 0 }
  0xca   : > { %1978 = vmatmul.mubr.msk.bf16.gmra.mrb[4].mxu0 %vm383_vm2, %v2300_v8  ;;  %v1583_v28 = vpop.permute.xlu1 %1582 }
  0xcb   : > { %1171 = vmatprep.mubr.bf16.mxu0 %v2390_v6  ;;  %v1589_v35 = vsel %vm1588_vm9, %v1581_v21, %v1583_v28 }
  0xcc   : > { %v1585_v27 = vpop.permute.xlu0 %1584  ;;  %v1599_v37 = vsel %vm390_vm1, %v1589_v35, 0 }
  0xcd   : > { %v1590_v30 = vsel %vm1588_vm9, %v1583_v28, %v1585_v27 }
  0xce   : > { %2072 = vmatmul.mubr.msk.bf16.vlgmr.msra.gmra.mrb[8].mxu1 %vm383_vm2, %v2573_v43  ;;  %v1587_v40 = vpop.permute.xlu1 %1586  ;;  %v2307_v43 = vld [vmem:[%s2797_s2 + $0x80] sm:$0xff]  }
  0xcf   : > { %2076 = vmatpush3.bf16.msra.mxu1 %v825_v12  ;;  %2077 = vmatprep.mubr.msk.bf16.mxu1 %vm383_vm2, %v2296_v50  ;;  %v1591_v41 = vsel %vm1588_vm9, %v1585_v27, %v1587_v40 }
  0xd0   : > { %2211 = vmatprep.subr.msk.bf16.mxu1 %vm390_vm1, %v967_v16  ;;  %v1605_v45 = vsel %vm390_vm1, %v1591_v41, 0 }
  0xd2   : > { %1988 = vmatmul.mubr.msk.bf16.vlgmr.msra.gmra.mrb[0].mxu0 %vm383_vm2, %v2301_v13 }
  0xd3   : > { %1181 = vmatprep.mubr.bf16.mxu0 %v2390_v6  ;;  %1296 = vmatpush1.bf16.msra.mxu0 %v1287_v17 }
  0xd4   : > { %2009 = vmatprep.subr.msk.bf16.mxu0 %vm390_vm1, %v1434_v18 }
  0xda   : > { %2078 = vmatmul.mubr.msk.bf16.vlgmr.msra.gmra.mrb[8].mxu1 %vm383_vm2, %v2298_v60  ;;  %1989 = vmatmul.mubr.msk.bf16.gmra.mrb[4].mxu0 %vm383_vm2, %v2302_v20 }
  0xdb   : > { %2082 = vmatpush3.bf16.msra.mxu1 %v981_v22  ;;  %1327 = vmatprep.mubr.bf16.mxu0 %v2390_v6 }
  0xdc   : > { %2212 = vmatprep.subr.msk.bf16.mxu1 %vm390_vm1, %v1123_v24  ;;  %2083 = vmatprep.mubr.msk.bf16.mxu1 %vm383_vm2, %v2299_v63 }
  0xdd   : > { %v1728_v54 = vpop.permute.xlu0 %1727 }
  0xdf   : > { %v1733_v59 = vpop.permute.xlu1 %1732 }
  0xe1   : > { %v1743_v10 = vpop.permute.xlu0 %1742 }
  0xe2   : > { %1999 = vmatmul.mubr.msk.bf16.vlgmr.msra.gmra.mrb[0].mxu0 %vm383_vm2, %v2303_v26 }
  0xe3   : > { %1337 = vmatprep.mubr.bf16.mxu0 %v2390_v6  ;;  %1452 = vmatpush1.bf16.msra.mxu0 %v1443_v29  ;;  %v1738_v4 = vpop.permute.xlu1 %1737 }
  0xe4   : > { %2020 = vmatprep.subr.msk.bf16.mxu0 %vm390_vm1, %v1590_v30 }
  0xe6   : > { %2084 = vmatmul.mubr.msk.bf16.vlgmr.msra.gmra.mrb[8].mxu1 %vm383_vm2, %v2300_v8 }
  0xe7   : > { %2088 = vmatpush3.bf16.msra.mxu1 %v1137_v32  ;;  %2089 = vmatprep.mubr.msk.bf16.mxu1 %vm383_vm2, %v2301_v13 }
  0xe8   : > { %2213 = vmatprep.subr.msk.bf16.mxu1 %vm390_vm1, %v1279_v31 }
  0xea   : > { %2000 = vmatmul.mubr.msk.bf16.gmra.mrb[4].mxu0 %vm383_vm2, %v2304_v33 }
  0xeb   : > { %1483 = vmatprep.mubr.bf16.mxu0 %v2390_v6 }
  0xf2   : > { %2090 = vmatmul.mubr.msk.bf16.vlgmr.msra.gmra.mrb[8].mxu1 %vm383_vm2, %v2302_v20  ;;  %2010 = vmatmul.mubr.msk.bf16.vlgmr.msra.gmra.mrb[0].mxu0 %vm383_vm2, %v2305_v34 }
  0xf3   : > { %2094 = vmatpush3.bf16.msra.mxu1 %v1293_v38  ;;  %1493 = vmatprep.mubr.bf16.mxu0 %v2390_v6 }
  0xf4   : > { %2214 = vmatprep.subr.msk.bf16.mxu1 %vm390_vm1, %v1435_v36  ;;  %1608 = vmatpush1.bf16.msra.mxu0 %v1599_v37 }
  0xf5   : > { %2095 = vmatprep.mubr.msk.bf16.mxu1 %vm383_vm2, %v2303_v26 }
  0xfa   : > { %2011 = vmatmul.mubr.msk.bf16.gmra.mrb[4].mxu0 %vm383_vm2, %v2306_v39 }
  0xfb   : > { %1639 = vmatprep.mubr.bf16.mxu0 %v2390_v6 }
  0xfe   : > { %2096 = vmatmul.mubr.msk.bf16.vlgmr.msra.gmra.mrb[8].mxu1 %vm383_vm2, %v2304_v33 }
  0xff   : > { %2100 = vmatpush3.bf16.msra.mxu1 %v1449_v42  ;;  %2101 = vmatprep.mubr.msk.bf16.mxu1 %vm383_vm2, %v2305_v34 }
 0x100   : > { %2215 = vmatprep.subr.msk.bf16.mxu1 %vm390_vm1, %v1591_v41 }
 0x102   : > { %2021 = vmatmul.mubr.msk.bf16.vlgmr.msra.gmra.mrb[0].mxu0 %vm383_vm2, %v2307_v43 }
 0x103   : > { %1649 = vmatprep.mubr.bf16.mxu0 %v2390_v6 }
 0x10a   : > { %2102 = vmatmul.mubr.msk.bf16.vlgmr.msra.gmra.mrb[8].mxu1 %vm383_vm2, %v2306_v39  ;;  %2022 = vmatmul.mubr.msk.bf16.gmra.mrb[4].mxu0 %vm383_vm2, %v2308_v44 }
 0x10b   : > { %2106 = vmatpush3.bf16.msra.mxu1 %v1605_v45  ;;  %2107 = vmatprep.mubr.msk.bf16.mxu1 %vm383_vm2, %v2307_v43 }
 0x116   : > { %2108 = vmatmul.mubr.msk.bf16.vlgmr.msra.gmra.mrb[8].mxu1 %vm383_vm2, %v2308_v44 }
 0x185   : > { %v561_v46 = vpop.f32.mrb[0].mxu1 }
 0x186   : > { %v563_v47 = vpop.f32.mrb[1].mxu1 }
 0x187   : > { %v565_v6 = vpop.f32.mrb[2].mxu1 }
 0x188   : > { %v567_v48 = vpop.f32.mrb[3].mxu1 }
 0x18d   : > { %v571_v49 = vpop.f32.mrb[4].mxu1 }
 0x18e   : > { %v573_v50 = vpop.f32.mrb[5].mxu1 }
 0x18f   : > { %v575_v51 = vpop.f32.mrb[6].mxu1 }
 0x190   : > { %v577_v52 = vpop.f32.mrb[7].mxu1 }
 0x1d5   : > { %v1641_v53 = vpop.f32.mrb[0].mxu0 }
 0x1d6   : > { %v2111_v55 = vadd.f32 %v1641_v53, %v561_v46  ;;  %v1643_v56 = vpop.f32.mrb[1].mxu0 }
 0x1d7   : > { %v2112_v57 = vadd.f32 %v1643_v56, %v563_v47  ;;  %v1645_v58 = vpop.f32.mrb[2].mxu0 }
 0x1d8   : > { %v1745_v60 = vadd.f32 %v2111_v55, %v1728_v54  ;;  %v2113_v61 = vadd.f32 %v1645_v58, %v565_v6  ;;  %v1647_v62 = vpop.f32.mrb[3].mxu0 }
 0x1d9   : > { %v1746_v63 = vadd.f32 %v2112_v57, %v1728_v54  ;;  %v2114_v0 = vadd.f32 %v1647_v62, %v567_v48 }
 0x1da   : > { %1757 = vst [vmem:[%s2724_s26] sm:$0xff] %v1745_v60  ;;  %v1748_v1 = vadd.f32 %v2113_v61, %v1733_v59 }
 0x1db   : > { %1758 = vst [vmem:[%s2724_s26 + $0x8] sm:$0xff] %v1746_v63  ;;  %v1749_v2 = vadd.f32 %v2114_v0, %v1733_v59 }
 0x1dc   : > { %1760 = vst [vmem:[%s2724_s26 + $0x18] sm:$0xff] %v1748_v1 }
 0x1dd   : > { %1761 = vst [vmem:[%s2724_s26 + $0x20] sm:$0xff] %v1749_v2  ;;  %v1651_v3 = vpop.f32.mrb[4].mxu0 }
 0x1de   : > { %v2115_v5 = vadd.f32 %v1651_v3, %v571_v49  ;;  %v1653_v7 = vpop.f32.mrb[5].mxu0 }
 0x1df   : > { %v2116_v8 = vadd.f32 %v1653_v7, %v573_v50  ;;  %v1655_v9 = vpop.f32.mrb[6].mxu0 }
 0x1e0   : > { %v2117_v11 = vadd.f32 %v1655_v9, %v575_v51  ;;  %v1751_v12 = vadd.f32 %v2115_v5, %v1738_v4  ;;  %v1657_v13 = vpop.f32.mrb[7].mxu0 }
 0x1e1   : > { %v1752_v14 = vadd.f32 %v2116_v8, %v1738_v4  ;;  %v2118_v15 = vadd.f32 %v1657_v13, %v577_v52 }
 0x1e2   : > { %1763 = vst [vmem:[%s2724_s26 + $0x30] sm:$0xff] %v1751_v12  ;;  %v1754_v16 = vadd.f32 %v2117_v11, %v1743_v10 }
 0x1e3   : > { %1764 = vst [vmem:[%s2724_s26 + $0x38] sm:$0xff] %v1752_v14  ;;  %v1755_v17 = vadd.f32 %v2118_v15, %v1743_v10 }
 0x1e4   : > { %1766 = vst [vmem:[%s2724_s26 + $0x48] sm:$0xff] %v1754_v16 }
 0x1e5   : > { %1767 = vst [vmem:[%s2724_s26 + $0x50] sm:$0xff] %v1755_v17 }
 0x1e9   : > { %v2109_v18 = vpop.f32.mrb[8].mxu1 }
 0x1ea   : > { %v1753_v19 = vadd.f32 %v2109_v18, %v1738_v4  ;;  %v1694_v20 = vpop.f32.mrb[9].mxu1 }
 0x1eb   : > { %v1747_v21 = vadd.f32 %v1728_v54, %v1694_v20  ;;  %v2110_v22 = vpop.f32.mrb[10].mxu1 }
 0x1ec   : > { %1765 = vst [vmem:[%s2724_s26 + $0x40] sm:$0xff] %v1753_v19  ;;  %v1756_v23 = vadd.f32 %v2110_v22, %v1743_v10  ;;  %v1697_v24 = vpop.f32.mrb[11].mxu1 }
 0x1ed   : > { %1759 = vst [vmem:[%s2724_s26 + $0x10] sm:$0xff] %v1747_v21  ;;  %v1750_v25 = vadd.f32 %v1733_v59, %v1697_v24 }
 0x1ee   : > { %1768 = vst [vmem:[%s2724_s26 + $0x58] sm:$0xff] %v1756_v23 }
 0x1ef   : > { %1762 = vst [vmem:[%s2724_s26 + $0x28] sm:$0xff] %v1750_v25 }
 0x1f0   : > { %2322 = shalt.err (!%p2319_p5)
}
 0x1f1   : > { %s2323_s12 = scalar_lea.hbm %s2740_s7, 1536  ;;  %s2327_s21 = scalar_lea.hbm %s2799_s4, 3072 }
 0x1f2   : > { %p2324_p6 = scmp.ne.s32.totalorder %s2740_s7, %s2323_s12  ;;  %p2328_p10 = scmp.lt.u32.totalorder %s2740_s7, %s2799_s4 }
 0x1f3   : > { %p2329_p11 = scmp.lt.u32.totalorder %s2327_s21, %s2323_s12  ;;  %p2331_p13 = scmp.lt.u32.totalorder %s2323_s12, %s2740_s7 }
 0x1f4   : > { %p2325_p7 = pnand %p2324_p6, %p2467_p4 }
 0x1f5   : > { %p2330_p12 = por %p2329_p11, %p2328_p10 }
 0x1f6   : > { %p2326_p9 = pneg %p2325_p7 }
 0x1f7   : > { %p2332_p0 = por %p2331_p13, %p2330_p12 }
 0x1f9   : > { %p2333_p1 = pnand %p2332_p0, %p2326_p9 }
 0x1fb   : > { %2336 = shalt.err (!%p2333_p1)
}
 0x1fc   : > { %s2400_s26 = smov 384   ;;  %s2401_s29 = smov 24  }
 0x1fd   : > { %2220 = dma.vmem_to_hbm [thread:$0]  (%p2467_p4), %s2743_s30, 1536, %s2740_s7, %s2749_s18, %s2400_s26, %s2400_s26, %s2401_s29  }
 0x1fe PF: > { %p2227_p2 = scmp.ge.s32.totalorder %s2387_s20, 2  ;;  %s1803_s5 = sand.u32 1, %s2367_s15  }
 0x1ff   : > { %s1804_s6 = scalar_lea.sflag [#allocation3], %s1803_s5 }
 0x200   : > { %p2223_p3 = pnand %p2227_p2, %p2474_p8 }
 0x202   : > { %2362 = dma.done.wait (!%p2223_p3), %s1804_s6, 1536  }
 0x203   : > { %2364 = vsyncadd (!%p2223_p3), %s1804_s6, 4294965760  ;;  %s17_s20 = sadd.s32 1, %s2387_s20   ;;  %s2802_s15 = smov %s2371_s16 }
 0x204   : > { %p14_p5 = scmp.ge.s32.totalorder %s17_s20, 4   ;;  %s2803_s16 = smov %s2375_s17 }
 0x205   : > { %s2804_s17 = smov %s2480_s28  ;;  %s2805_s18 = smov %s2383_s19 }
 0x206   : > { %s2806_s19 = smov %s2808_s23  ;;  %16 = sbr.rel (!%p14_p5) target bundleno = 4 (0x4), region = 88 }
 0x20d   :  { %1809 = vsyncpa [#allocation3], 1 }
 0x20e   :  { %1811 = vsyncpa [#allocation3 + $0x1], 1 }

</bundles_post_ra>
